<compile_context>
chip_gen: v6e
topology: v6e:2x2x1
jax: 0.10.0
libtpu: 0.0.40
codegen_flags: <defaults>
</compile_context>

<pallas_src>
import functools

import jax
import jax.numpy as jnp
from jax.experimental import pallas as pl
from jax.experimental.pallas import tpu as pltpu


def _round_up(x, m):
    return (x + m - 1) // m * m


def ffn_kernel(x_ref, w1_ref, b1_ref, w2_ref, b2_ref, o_ref, *, hid_chunk):
    """Fused matmul -> ReLU -> matmul -> residual on one row tile.

    x_ref : (TM, Cp)   bf16 block of flattened activations (also the residual)
    w1_ref: (Cp, Hp)   bf16 folded fc1 weight
    b1_ref: (1, Hp)    f32  folded fc1 bias
    w2_ref: (Hp, Cp)   bf16 folded fc2 weight
    b2_ref: (1, Cp)    f32  folded fc2 bias
    o_ref : (TM, Cp)   f32 output
    """
    x = x_ref[...]                                   # bf16, feeds the MXU
    # Residual + fc2 bias in f32 (only the bf16 rounding of x is lost).
    acc = x.astype(jnp.float32) + b2_ref[...]
    chid = w1_ref.shape[1]
    # Static chunking over the hidden dim keeps the (TM, chunk) f32
    # intermediate small (vreg-friendly) even for large expansion ratios.
    for k0 in range(0, chid, hid_chunk):
        k1 = min(k0 + hid_chunk, chid)
        h = jnp.dot(x, w1_ref[:, k0:k1], preferred_element_type=jnp.float32)
        h = jnp.maximum(h + b1_ref[:, k0:k1], 0.0)   # bias + ReLU in f32
        acc = acc + jnp.dot(h.astype(w2_ref.dtype), w2_ref[k0:k1, :],
                            preferred_element_type=jnp.float32)
    o_ref[...] = acc.astype(o_ref.dtype)


def fold_conv_bn(w, b, gamma, beta, mean, var, eps=1e-5):
    """Fold eval-mode BatchNorm2d into a 1x1 conv.

    w: (Cout, Cin) squeezed 1x1 conv weight, b: (Cout,)
    returns (w_folded transposed to (Cin, Cout), b_folded (Cout,)) in f32.
    """
    scale = gamma / jnp.sqrt(var + eps)
    w_f = w * scale[:, None]            # (Cout, Cin)
    b_f = (b - mean) * scale + beta     # (Cout,)
    return w_f.T, b_f                   # (Cin, Cout), (Cout,)


@functools.partial(jax.jit, static_argnames=("tm", "hid_chunk"))
def ffn_forward_nhwc(x_nhwc, params, tm=512, hid_chunk=512):
    """NHWC fast path (no layout transposes). x_nhwc: (N, H, W, Cin) f32."""
    N, H, W, Cin = x_nhwc.shape

    w1t, b1 = fold_conv_bn(params["w1"], params["b1"], params["g1"],
                           params["be1"], params["m1"], params["v1"])
    w2t, b2 = fold_conv_bn(params["w2"], params["b2"], params["g2"],
                           params["be2"], params["m2"], params["v2"])
    Chid = w1t.shape[1]
    Cout = w2t.shape[1]
    assert Cout == Cin, "residual add requires out_features == in_features"

    # Lane-dense padding: channel dims to multiples of 128 (zero pad is exact:
    # extra inputs/hidden units contribute 0 through the zero-padded weights).
    Cp = _round_up(Cin, 128)
    Hp = _round_up(Chid, 128)

    # Row tiling: pad M up to a multiple of the tile; clamp the tile for tiny M.
    M = N * H * W
    tm_eff = min(tm, _round_up(M, 256))
    Mp = _round_up(M, tm_eff)

    x2d = x_nhwc.reshape(M, Cin)
    x2d = jnp.pad(x2d, ((0, Mp - M), (0, Cp - Cin)))
    x_bf = x2d.astype(jnp.bfloat16)                                  # bf16 MXU input

    w1p = jnp.pad(w1t, ((0, Cp - Cin), (0, Hp - Chid))).astype(jnp.bfloat16)
    w2p = jnp.pad(w2t, ((0, Hp - Chid), (0, Cp - Cout))).astype(jnp.bfloat16)
    b1p = jnp.pad(b1, (0, Hp - Chid)).reshape(1, Hp)                 # f32 bias
    b2p = jnp.pad(b2, (0, Cp - Cout)).reshape(1, Cp)                 # f32 bias

    hid_chunk_eff = max(128, min(hid_chunk, Hp))

    # VMEM budget: double-buffered activation/output tiles + resident weights.
    bytes_x = 2 * tm_eff * Cp * 2
    bytes_o = 2 * tm_eff * Cp * 4
    bytes_w = 2 * ((Cp * Hp + Hp * Cp) * 2 + (Hp + Cp) * 4)
    vmem_need = bytes_x + bytes_o + bytes_w
    # Cap at 64 MiB so the same config stays legal on v7x (64 MiB physical VMEM).
    vmem_limit = int(min(64 * 1024 * 1024, max(32 * 1024 * 1024, 2 * vmem_need)))

    flops = 2 * Mp * (Cp * Hp + Hp * Cp)
    bytes_accessed = (Mp * Cp * 2            # bf16 activations in
                      + Mp * Cp * 4          # f32 output
                      + (Cp * Hp + Hp * Cp) * 2 + (Hp + Cp) * 4)

    kernel = functools.partial(ffn_kernel, hid_chunk=hid_chunk_eff)

    out2d = pl.pallas_call(
        kernel,
        out_shape=jax.ShapeDtypeStruct((Mp, Cp), jnp.float32),
        grid_spec=pltpu.PrefetchScalarGridSpec(
            num_scalar_prefetch=0,
            grid=(Mp // tm_eff,),
            in_specs=[
                pl.BlockSpec((tm_eff, Cp), lambda i: (i, 0)),
                pl.BlockSpec((Cp, Hp), lambda i: (0, 0)),   # weights resident
                pl.BlockSpec((1, Hp), lambda i: (0, 0)),
                pl.BlockSpec((Hp, Cp), lambda i: (0, 0)),
                pl.BlockSpec((1, Cp), lambda i: (0, 0)),
            ],
            out_specs=pl.BlockSpec((tm_eff, Cp), lambda i: (i, 0)),
        ),
        compiler_params=pltpu.CompilerParams(
            dimension_semantics=("parallel",),
            vmem_limit_bytes=vmem_limit),
        cost_estimate=pl.CostEstimate(flops=flops, transcendentals=0,
                                      bytes_accessed=bytes_accessed),
    )(x_bf, w1p, b1p, w2p, b2p)

    return out2d[:M, :Cout].reshape(N, H, W, Cout)


@functools.partial(jax.jit, static_argnames=("tm", "hid_chunk"))
def ffn_forward(x_nchw, params, tm=512, hid_chunk=512):
    """NCHW wrapper matching the PyTorch module interface.

    The transposes exist only to honor the NCHW spec; in an NHWC pipeline call
    ffn_forward_nhwc directly and both full-tensor transposes disappear.
    """
    x_nhwc = jnp.transpose(x_nchw, (0, 2, 3, 1))
    y = ffn_forward_nhwc(x_nhwc, params, tm=tm, hid_chunk=hid_chunk)
    return jnp.transpose(y, (0, 3, 1, 2))


def init_params(key, in_features, hidden_features):
    """Deterministic synthetic parameters matching FFN.__init__ shapes."""
    ks = jax.random.split(key, 8)
    out_features = in_features
    p = {
        # fc1: Conv2d(in, hidden, 1) + BatchNorm2d(hidden)
        "w1": jax.random.normal(ks[0], (hidden_features, in_features), jnp.float32) * 0.1,
        "b1": jax.random.normal(ks[1], (hidden_features,), jnp.float32) * 0.1,
        "g1": jnp.ones((hidden_features,), jnp.float32)
              + 0.05 * jax.random.normal(ks[2], (hidden_features,), jnp.float32),
        "be1": 0.05 * jax.random.normal(ks[3], (hidden_features,), jnp.float32),
        "m1": 0.1 * jax.random.normal(ks[4], (hidden_features,), jnp.float32),
        "v1": jnp.ones((hidden_features,), jnp.float32) * 0.9,
        # fc2: Conv2d(hidden, out, 1) + BatchNorm2d(out)
        "w2": jax.random.normal(ks[5], (out_features, hidden_features), jnp.float32) * 0.1,
        "b2": jax.random.normal(ks[6], (out_features,), jnp.float32) * 0.1,
        "g2": jnp.ones((out_features,), jnp.float32),
        "be2": 0.05 * jax.random.normal(ks[7], (out_features,), jnp.float32),
        "m2": jnp.zeros((out_features,), jnp.float32),
        "v2": jnp.ones((out_features,), jnp.float32),
    }
    return p


def ffn_reference_f32(x_nchw, params):
    """Pure-f32 reference of the eval-mode-BN forward pass."""
    w1t, b1 = fold_conv_bn(params["w1"], params["b1"], params["g1"],
                           params["be1"], params["m1"], params["v1"])
    w2t, b2 = fold_conv_bn(params["w2"], params["b2"], params["g2"],
                           params["be2"], params["m2"], params["v2"])
    x = jnp.transpose(x_nchw, (0, 2, 3, 1))
    h = jnp.maximum(x @ w1t + b1, 0.0)
    y = h @ w2t + b2 + x
    return jnp.transpose(y, (0, 3, 1, 2))


def ffn_reference_bf16(x_nchw, params):
    """Reference matching the kernel's numerics: bf16 MXU inputs, f32 accumulate."""
    w1t, b1 = fold_conv_bn(params["w1"], params["b1"], params["g1"],
                           params["be1"], params["m1"], params["v1"])
    w2t, b2 = fold_conv_bn(params["w2"], params["b2"], params["g2"],
                           params["be2"], params["m2"], params["v2"])
    x = jnp.transpose(x_nchw, (0, 2, 3, 1))
    xb = x.astype(jnp.bfloat16)
    h = jnp.dot(xb, w1t.astype(jnp.bfloat16),
                preferred_element_type=jnp.float32) + b1
    h = jnp.maximum(h, 0.0).astype(jnp.bfloat16)
    y = jnp.dot(h, w2t.astype(jnp.bfloat16),
                preferred_element_type=jnp.float32) + b2 + xb.astype(jnp.float32)
    return jnp.transpose(y, (0, 3, 1, 2))


if __name__ == "__main__":
    key = jax.random.PRNGKey(0)
    kx, kp = jax.random.split(key)

    N, Cin, H, W = 2, 4, 16, 16          # batch=2, channels=4, spatial=16
    hidden = 8
    x = jax.random.normal(kx, (N, Cin, H, W), jnp.float32)
    params = init_params(kp, Cin, hidden)

    out = ffn_forward(x, params)
    out = jax.block_until_ready(out)
    assert out.shape == x.shape

    ref_bf16 = ffn_reference_bf16(x, params)   # same numerics as the kernel
    ref_f32 = ffn_reference_f32(x, params)     # full-precision sanity check
    assert jnp.allclose(out, ref_bf16, atol=1e-4, rtol=1e-4), "mismatch vs bf16 reference"
    assert jnp.allclose(out, ref_f32, atol=5e-2, rtol=5e-2), "mismatch vs f32 reference"

    print("KERNEL_OK")
</pallas_src>

<mosaic_0001>
module attributes {stable_mosaic.version = 11 : i64} {
  func.func @ffn_kernel(%arg0: i32, %arg1: memref<512x128xbf16, #tpu.memory_space<vmem>>, %arg2: memref<128x128xbf16, #tpu.memory_space<vmem>>, %arg3: memref<1x128xf32, #tpu.memory_space<vmem>>, %arg4: memref<128x128xbf16, #tpu.memory_space<vmem>>, %arg5: memref<1x128xf32, #tpu.memory_space<vmem>>, %arg6: memref<512x128xf32, #tpu.memory_space<vmem>>) attributes {dimension_semantics = [#tpu.dimension_semantics<parallel>], iteration_bounds = array<i64: 1>, scalar_prefetch = 0 : i64, scratch_operands = 0 : i64, tpu.core_type = #tpu.core_type<tc>, window_params = [{transform_indices = @transform_0, window_bounds = array<i64: 512, 128>}, {pipeline_mode = #tpu.pipeline_mode<synchronous>, transform_indices = @transform_1, window_bounds = array<i64: 128, 128>}, {pipeline_mode = #tpu.pipeline_mode<synchronous>, transform_indices = @transform_2, window_bounds = array<i64: 1, 128>}, {pipeline_mode = #tpu.pipeline_mode<synchronous>, transform_indices = @transform_3, window_bounds = array<i64: 128, 128>}, {pipeline_mode = #tpu.pipeline_mode<synchronous>, transform_indices = @transform_4, window_bounds = array<i64: 1, 128>}, {transform_indices = @transform_5, window_bounds = array<i64: 512, 128>}]} {
    %c0 = arith.constant 0 : index
    %c0_0 = arith.constant 0 : index
    %0 = vector.load %arg1[%c0, %c0_0] : memref<512x128xbf16, #tpu.memory_space<vmem>>, vector<512x128xbf16>
    %1 = arith.extf %0 : vector<512x128xbf16> to vector<512x128xf32>
    %c0_1 = arith.constant 0 : index
    %c0_2 = arith.constant 0 : index
    %2 = vector.load %arg5[%c0_1, %c0_2] : memref<1x128xf32, #tpu.memory_space<vmem>>, vector<1x128xf32>
    %3 = vector.broadcast %2 : vector<1x128xf32> to vector<512x128xf32>
    %4 = arith.addf %1, %3 : vector<512x128xf32>
    %c0_3 = arith.constant 0 : index
    %c0_4 = arith.constant 0 : index
    %5 = vector.load %arg2[%c0_3, %c0_4] : memref<128x128xbf16, #tpu.memory_space<vmem>>, vector<128x128xbf16>
    %cst = arith.constant dense<0.000000e+00> : vector<512x128xf32>
    %6 = tpu.matmul %0, %5, %cst {dimension_numbers = #tpu.dot_dimension_numbers<[1], [0], [0], [1], [0, 0, 1, 1], [], []>} : vector<512x128xbf16>, vector<128x128xbf16>, vector<512x128xf32> -> vector<512x128xf32>
    %c0_5 = arith.constant 0 : index
    %c0_6 = arith.constant 0 : index
    %7 = vector.load %arg3[%c0_5, %c0_6] : memref<1x128xf32, #tpu.memory_space<vmem>>, vector<1x128xf32>
    %8 = vector.broadcast %7 : vector<1x128xf32> to vector<512x128xf32>
    %9 = arith.addf %6, %8 : vector<512x128xf32>
    %cst_7 = arith.constant 0.000000e+00 : f32
    %10 = vector.broadcast %cst_7 : f32 to vector<512x128xf32>
    %11 = arith.maximumf %9, %10 : vector<512x128xf32>
    %12 = arith.truncf %11 : vector<512x128xf32> to vector<512x128xbf16>
    %c0_8 = arith.constant 0 : index
    %c0_9 = arith.constant 0 : index
    %13 = vector.load %arg4[%c0_8, %c0_9] : memref<128x128xbf16, #tpu.memory_space<vmem>>, vector<128x128xbf16>
    %cst_10 = arith.constant dense<0.000000e+00> : vector<512x128xf32>
    %14 = tpu.matmul %12, %13, %cst_10 {dimension_numbers = #tpu.dot_dimension_numbers<[1], [0], [0], [1], [0, 0, 1, 1], [], []>} : vector<512x128xbf16>, vector<128x128xbf16>, vector<512x128xf32> -> vector<512x128xf32>
    %15 = arith.addf %4, %14 : vector<512x128xf32>
    %c0_11 = arith.constant 0 : index
    %c0_12 = arith.constant 0 : index
    %16 = vector.load %arg6[%c0_11, %c0_12] : memref<512x128xf32, #tpu.memory_space<vmem>>, vector<512x128xf32>
    tpu.vector_store %arg6[%c0_11, %c0_12], %15 {strides = array<i32>} : memref<512x128xf32, #tpu.memory_space<vmem>>, vector<512x128xf32>,
    return
  }
  func.func @transform_0(%arg0: i32) -> (i32, i32) {
    %c0_i32 = arith.constant 0 : i32
    %c0_i32_0 = arith.constant 0 : i32
    return %arg0, %c0_i32 : i32, i32
  }
  func.func @transform_1(%arg0: i32) -> (i32, i32) {
    %c0_i32 = arith.constant 0 : i32
    %c0_i32_0 = arith.constant 0 : i32
    %c0_i32_1 = arith.constant 0 : i32
    return %c0_i32, %c0_i32_0 : i32, i32
  }
  func.func @transform_2(%arg0: i32) -> (i32, i32) {
    %c0_i32 = arith.constant 0 : i32
    %c0_i32_0 = arith.constant 0 : i32
    %c0_i32_1 = arith.constant 0 : i32
    return %c0_i32, %c0_i32_0 : i32, i32
  }
  func.func @transform_3(%arg0: i32) -> (i32, i32) {
    %c0_i32 = arith.constant 0 : i32
    %c0_i32_0 = arith.constant 0 : i32
    %c0_i32_1 = arith.constant 0 : i32
    return %c0_i32, %c0_i32_0 : i32, i32
  }
  func.func @transform_4(%arg0: i32) -> (i32, i32) {
    %c0_i32 = arith.constant 0 : i32
    %c0_i32_0 = arith.constant 0 : i32
    %c0_i32_1 = arith.constant 0 : i32
    return %c0_i32, %c0_i32_0 : i32, i32
  }
  func.func @transform_5(%arg0: i32) -> (i32, i32) {
    %c0_i32 = arith.constant 0 : i32
    %c0_i32_0 = arith.constant 0 : i32
    return %arg0, %c0_i32 : i32, i32
  }
}

</mosaic_0001>

<bundles_post_ra>
// kernel: ffn_forward_nhwc.1
= control target key start
LH: loop header
LB: loop body
LE: loop exit
PB: predicated region body
PF: predicated region fallthrough
CT: control target
= control target key end

     0   :  { %s2386_s1 = inlined_call_operand.vmem [shape: bf16[128,128], index: 1, kind: input, shape index: {}]   ;;  %s2387_s0 = inlined_call_operand.vmem [shape: bf16[512,128], index: 0, kind: input, shape index: {}]   ;;  %s2388_s3 = inlined_call_operand.vmem [shape: bf16[128,128], index: 3, kind: input, shape index: {}]   ;;  %s2389_s2 = inlined_call_operand.vmem [shape: f32[1,128], index: 2, kind: input, shape index: {}]   ;;  %s2390_s4 = inlined_call_operand.vmem [shape: f32[1,128], index: 4, kind: input, shape index: {}]   ;;  %s2391_s5 = inlined_call_operand.vmem [shape: f32[512,128], index: 5, kind: output, shape index: {}]  }
   0x1   :  { %v1643_v0 = vld [vmem:[%s2386_s1 + $0x38] sm:$0xff]   ;;  %v1644_v1 = vld [vmem:[%s2386_s1 + $0x30] sm:$0xff]   ;;  %v1645_v2 = vld [vmem:[%s2386_s1 + $0x28] sm:$0xff]  }
   0x2   :  { %1483 = vmatprep.subr.bf16.mxu0 %v1643_v0  ;;  %v1646_v3 = vld [vmem:[%s2386_s1 + $0x20] sm:$0xff]   ;;  %v1647_v5 = vld [vmem:[%s2386_s1 + $0x18] sm:$0xff]   ;;  %v1648_v6 = vld [vmem:[%s2386_s1 + $0x10] sm:$0xff]  }
   0x3   :  { %1484 = vmatpush3.bf16.msra.mxu0 %v1643_v0  ;;  %v1777_v4 = vld [vmem:[%s2387_s0] sm:$0xff]   ;;  %v1649_v7 = vld [vmem:[%s2386_s1 + $0x8] sm:$0xff]   ;;  %v1800_v10 = vld [vmem:[%s2387_s0 + $0x10] sm:$0xff]  }
   0x4   :  { %1485 = vmatprep.subr.bf16.mxu0 %v1644_v1  ;;  %1499 = vmatprep.mubr.bf16.mxu0 %v1777_v4  ;;  %v1650_v8 = vld [vmem:[%s2386_s1] sm:$0xff]   ;;  %v1795_v9 = vld [vmem:[%s2387_s0 + $0x8] sm:$0xff]   ;;  %v1683_v11 = vld [vmem:[%s2388_s3 + $0x38] sm:$0xff]  }
   0x5   :  { %v1684_v12 = vld [vmem:[%s2388_s3 + $0x30] sm:$0xff]   ;;  %1563 = vmatprep.subr.bf16.mxu1 %v1683_v11  ;;  %v1685_v13 = vld [vmem:[%s2388_s3 + $0x28] sm:$0xff]   ;;  %v1816_v14 = vld [vmem:[%s2387_s0 + $0x18] sm:$0xff]  }
   0x6   :  { %1564 = vmatpush3.bf16.msra.mxu1 %v1683_v11  ;;  %v1686_v15 = vld [vmem:[%s2388_s3 + $0x20] sm:$0xff]   ;;  %v1687_v17 = vld [vmem:[%s2388_s3 + $0x18] sm:$0xff]   ;;  %v1834_v18 = vld [vmem:[%s2387_s0 + $0x28] sm:$0xff]  }
   0x7   :  { %1486 = vmatpush3.bf16.msra.mxu0 %v1644_v1  ;;  %1565 = vmatprep.subr.bf16.mxu1 %v1684_v12  ;;  %v1824_v16 = vld [vmem:[%s2387_s0 + $0x20] sm:$0xff]   ;;  %v1839_v19 = vld [vmem:[%s2387_s0 + $0x30] sm:$0xff]   ;;  %v1846_v20 = vld [vmem:[%s2387_s0 + $0x38] sm:$0xff]  }
   0x8   :  { %1487 = vmatprep.subr.bf16.mxu0 %v1645_v2  ;;  %v1851_v21 = vld [vmem:[%s2387_s0 + $0x40] sm:$0xff]   ;;  %v1858_v22 = vld [vmem:[%s2387_s0 + $0x48] sm:$0xff]   ;;  %v1863_v23 = vld [vmem:[%s2387_s0 + $0x50] sm:$0xff]  }
   0x9   :  { %v1870_v24 = vld [vmem:[%s2387_s0 + $0x58] sm:$0xff]   ;;  %v1875_v25 = vld [vmem:[%s2387_s0 + $0x60] sm:$0xff]   ;;  %v1882_v26 = vld [vmem:[%s2387_s0 + $0x68] sm:$0xff]  }
   0xa   :  { %1566 = vmatpush3.bf16.msra.mxu1 %v1684_v12  ;;  %v1887_v27 = vld [vmem:[%s2387_s0 + $0x70] sm:$0xff]   ;;  %v1894_v28 = vld [vmem:[%s2387_s0 + $0x78] sm:$0xff]   ;;  %v1899_v29 = vld [vmem:[%s2387_s0 + $0x80] sm:$0xff]  }
   0xb   :  { %1488 = vmatpush3.bf16.msra.mxu0 %v1645_v2  ;;  %1567 = vmatprep.subr.bf16.mxu1 %v1685_v13  ;;  %v1906_v30 = vld [vmem:[%s2387_s0 + $0x88] sm:$0xff]   ;;  %v1911_v31 = vld [vmem:[%s2387_s0 + $0x90] sm:$0xff]   ;;  %v1921_v33 = vld [vmem:[%s2387_s0 + $0x98] sm:$0xff]  }
   0xc   :  { %1489 = vmatprep.subr.bf16.mxu0 %v1646_v3  ;;  %v1688_v32 = vld [vmem:[%s2388_s3 + $0x10] sm:$0xff]   ;;  %v1926_v34 = vld [vmem:[%s2387_s0 + $0xa0] sm:$0xff]   ;;  %v1689_v35 = vld [vmem:[%s2388_s3 + $0x8] sm:$0xff]  }
   0xd   :  { %v1690_v36 = vld [vmem:[%s2388_s3] sm:$0xff]   ;;  %v1939_v37 = vld [vmem:[%s2387_s0 + $0xa8] sm:$0xff]   ;;  %v1944_v38 = vld [vmem:[%s2387_s0 + $0xb0] sm:$0xff]  }
   0xe   :  { %1568 = vmatpush3.bf16.msra.mxu1 %v1685_v13  ;;  %v1951_v39 = vld [vmem:[%s2387_s0 + $0xb8] sm:$0xff]   ;;  %v69_v40 = vld [vmem:[%s2387_s0 + $0xc0] sm:$0xff]   ;;  %v1960_v41 = vld [vmem:[%s2387_s0 + $0xc8] sm:$0xff]  }
   0xf   :  { %1490 = vmatpush3.bf16.msra.mxu0 %v1646_v3  ;;  %1569 = vmatprep.subr.bf16.mxu1 %v1686_v15  ;;  %v73_v42 = vld [vmem:[%s2387_s0 + $0xd0] sm:$0xff]   ;;  %v75_v43 = vld [vmem:[%s2387_s0 + $0xd8] sm:$0xff]   ;;  %v77_v44 = vld [vmem:[%s2387_s0 + $0xe0] sm:$0xff]  }
  0x10   :  { %1491 = vmatprep.subr.bf16.mxu0 %v1647_v5  ;;  %v79_v45 = vld [vmem:[%s2387_s0 + $0xe8] sm:$0xff]   ;;  %v81_v46 = vld [vmem:[%s2387_s0 + $0xf0] sm:$0xff]   ;;  %v83_v47 = vld [vmem:[%s2387_s0 + $0xf8] sm:$0xff]  }
  0x11   :  { %v1984_v50 = vld [vmem:[%s2389_s2] ss:$0 sm:$0xff] }
  0x12   :  { %1570 = vmatpush3.bf16.msra.mxu1 %v1686_v15 }
  0x13   :  { %1492 = vmatpush3.bf16.msra.mxu0 %v1647_v5  ;;  %1571 = vmatprep.subr.bf16.mxu1 %v1687_v17 }
  0x14   :  { %1493 = vmatprep.subr.bf16.mxu0 %v1648_v6 }
  0x16   :  { %1572 = vmatpush3.bf16.msra.mxu1 %v1687_v17 }
  0x17   :  { %1494 = vmatpush3.bf16.msra.mxu0 %v1648_v6  ;;  %1573 = vmatprep.subr.bf16.mxu1 %v1688_v32 }
  0x18   :  { %1495 = vmatprep.subr.bf16.mxu0 %v1649_v7 }
  0x1a   :  { %1574 = vmatpush3.bf16.msra.mxu1 %v1688_v32 }
  0x1b   :  { %1496 = vmatpush3.bf16.msra.mxu0 %v1649_v7  ;;  %1575 = vmatprep.subr.bf16.mxu1 %v1689_v35 }
  0x1c   :  { %1497 = vmatprep.subr.bf16.mxu0 %v1650_v8 }
  0x1e   :  { %1576 = vmatpush3.bf16.msra.mxu1 %v1689_v35 }
  0x1f   :  { %1498 = vmatpush3.bf16.msra.mxu0 %v1650_v8  ;;  %1577 = vmatprep.subr.bf16.mxu1 %v1690_v36 }
  0x22   :  { %1500 = vmatmul.mubr.bf16.vlgmr.msra.gmra.mxu0 %v1795_v9  ;;  %1578 = vmatpush3.bf16.msra.mxu1 %v1690_v36 }
  0x23   :  { %1503 = vmatprep.mubr.bf16.mxu0 %v1800_v10 }
  0x2a   :  { %1504 = vmatmul.mubr.bf16.gmra.mxu0 %v1816_v14 }
  0x2b   :  { %1507 = vmatprep.mubr.bf16.mxu0 %v1824_v16 }
  0x32   :  { %1508 = vmatmul.mubr.bf16.gmra.mxu0 %v1834_v18 }
  0x33   :  { %1511 = vmatprep.mubr.bf16.mxu0 %v1839_v19 }
  0x3a   :  { %1512 = vmatmul.mubr.bf16.gmra.mxu0 %v1846_v20 }
  0x3b   :  { %1515 = vmatprep.mubr.bf16.mxu0 %v1851_v21 }
  0x42   :  { %1516 = vmatmul.mubr.bf16.gmra.mxu0 %v1858_v22 }
  0x43   :  { %1519 = vmatprep.mubr.bf16.mxu0 %v1863_v23 }
  0x4a   :  { %1520 = vmatmul.mubr.bf16.gmra.mxu0 %v1870_v24 }
  0x4b   :  { %1523 = vmatprep.mubr.bf16.mxu0 %v1875_v25 }
  0x52   :  { %1524 = vmatmul.mubr.bf16.gmra.mxu0 %v1882_v26 }
  0x53   :  { %1527 = vmatprep.mubr.bf16.mxu0 %v1887_v27 }
  0x5a   :  { %1528 = vmatmul.mubr.bf16.gmra.mxu0 %v1894_v28 }
  0x5b   :  { %1531 = vmatprep.mubr.bf16.mxu0 %v1899_v29 }
  0x62   :  { %1532 = vmatmul.mubr.bf16.gmra.mxu0 %v1906_v30 }
  0x63   :  { %1535 = vmatprep.mubr.bf16.mxu0 %v1911_v31 }
  0x6a   :  { %1536 = vmatmul.mubr.bf16.gmra.mxu0 %v1921_v33 }
  0x6b   :  { %1539 = vmatprep.mubr.bf16.mxu0 %v1926_v34 }
  0x72   :  { %1540 = vmatmul.mubr.bf16.gmra.mxu0 %v1939_v37 }
  0x73   :  { %1543 = vmatprep.mubr.bf16.mxu0 %v1944_v38 }
  0x7a   :  { %1544 = vmatmul.mubr.bf16.gmra.mxu0 %v1951_v39 }
  0x7b   :  { %1547 = vmatprep.mubr.bf16.mxu0 %v69_v40 }
  0x82   :  { %1548 = vmatmul.mubr.bf16.gmra.mxu0 %v1960_v41 }
  0x83   :  { %1551 = vmatprep.mubr.bf16.mxu0 %v73_v42 }
  0x8a   :  { %1552 = vmatmul.mubr.bf16.gmra.mxu0 %v75_v43 }
  0x8b   :  { %1555 = vmatprep.mubr.bf16.mxu0 %v77_v44 }
  0x92   :  { %1556 = vmatmul.mubr.bf16.gmra.mxu0 %v79_v45 }
  0x93   :  { %1559 = vmatprep.mubr.bf16.mxu0 %v81_v46 }
  0x9a   :  { %1560 = vmatmul.mubr.bf16.gmra.mxu0 %v83_v47 }
  0xe2   :  { %v1501_v48 = vpop.f32.mrf.mxu0 }
  0xe3   :  { %v526_v54 = vadd.f32 %v1501_v48, %v1984_v50 }
  0xe4   :  { %v517_v49 = vpop.f32.mrf.mxu0 }
  0xe5   :  { %v518_v52 = vadd.f32 %v1984_v50, %v517_v49  ;;  %v774_v61 = vmax.f32 %v526_v54, 0.0 }
  0xe6   :  { %v1502_v51 = vpop.f32.mrf.mxu0 }
  0xe7   :  { %v529_v53 = vadd.f32 %v1502_v51, %v1984_v50  ;;  %v772_v59 = vmax.f32 %v518_v52, 0.0 }
  0xe8   :  { %v520_v55 = vpop.f32.mrf.mxu0 }
  0xe9   :  { %v521_v56 = vadd.f32 %v1984_v50, %v520_v55  ;;  %v775_v57 = vmax.f32 %v529_v53, 0.0 }
  0xea   :  { %v1505_v58 = vpop.f32.mrf.mxu0 }
  0xeb   :  { %v773_v60 = vmax.f32 %v521_v56, 0.0  ;;  %v837_v0 = vpack.c.bf16 %v775_v57, %v774_v61  ;;  %v542_v5 = vadd.f32 %v1505_v58, %v1984_v50 }
  0xec   :  { %v533_v62 = vpop.f32.mrf.mxu0 }
  0xed   :  { %v836_v63 = vpack.c.bf16 %v773_v60, %v772_v59  ;;  %v534_v2 = vadd.f32 %v1984_v50, %v533_v62  ;;  %v778_v15 = vmax.f32 %v542_v5, 0.0 }
  0xee   :  { %v1506_v1 = vpop.f32.mrf.mxu0 }
  0xef   :  { %v545_v3 = vadd.f32 %v1506_v1, %v1984_v50  ;;  %1579 = vmatprep.mubr.bf16.mxu1 %v836_v63  ;;  %v776_v12 = vmax.f32 %v534_v2, 0.0 }
  0xf0   :  { %v536_v6 = vpop.f32.mrf.mxu0  ;;  %1580 = vmatmul.mubr.bf16.vlgmr.msra.gmra.mxu1 %v837_v0 }
  0xf1   :  { %v537_v7 = vadd.f32 %v1984_v50, %v536_v6  ;;  %v779_v8 = vmax.f32 %v545_v3, 0.0 }
  0xf2   :  { %v1509_v11 = vpop.f32.mrf.mxu0 }
  0xf3   :  { %v777_v13 = vmax.f32 %v537_v7, 0.0  ;;  %v839_v35 = vpack.c.bf16 %v779_v8, %v778_v15  ;;  %v558_v43 = vadd.f32 %v1509_v11, %v1984_v50 }
  0xf4   :  { %v549_v17 = vpop.f32.mrf.mxu0 }
  0xf5   :  { %v838_v32 = vpack.c.bf16 %v777_v13, %v776_v12  ;;  %v550_v40 = vadd.f32 %v1984_v50, %v549_v17  ;;  %v782_v51 = vmax.f32 %v558_v43, 0.0 }
  0xf6   :  { %v1510_v36 = vpop.f32.mrf.mxu0 }
  0xf7   :  { %v561_v42 = vadd.f32 %v1510_v36, %v1984_v50  ;;  %1583 = vmatprep.mubr.bf16.mxu1 %v838_v32  ;;  %v780_v48 = vmax.f32 %v550_v40, 0.0 }
  0xf8   :  { %v552_v44 = vpop.f32.mrf.mxu0  ;;  %1584 = vmatmul.mubr.bf16.gmra.mxu1 %v839_v35 }
  0xf9   :  { %v553_v45 = vadd.f32 %v1984_v50, %v552_v44  ;;  %v783_v46 = vmax.f32 %v561_v42, 0.0 }
  0xfa   :  { %v1513_v47 = vpop.f32.mrf.mxu0 }
  0xfb   :  { %v781_v49 = vmax.f32 %v553_v45, 0.0  ;;  %v841_v54 = vpack.c.bf16 %v783_v46, %v782_v51  ;;  %v574_v58 = vadd.f32 %v1513_v47, %v1984_v50 }
  0xfc   :  { %v565_v52 = vpop.f32.mrf.mxu0 }
  0xfd   :  { %v840_v53 = vpack.c.bf16 %v781_v49, %v780_v48  ;;  %v566_v56 = vadd.f32 %v1984_v50, %v565_v52  ;;  %v786_v1 = vmax.f32 %v574_v58, 0.0 }
  0xfe   :  { %v1514_v55 = vpop.f32.mrf.mxu0 }
  0xff   :  { %v577_v57 = vadd.f32 %v1514_v55, %v1984_v50  ;;  %1587 = vmatprep.mubr.bf16.mxu1 %v840_v53  ;;  %v784_v63 = vmax.f32 %v566_v56, 0.0 }
 0x100   :  { %v568_v59 = vpop.f32.mrf.mxu0  ;;  %1588 = vmatmul.mubr.bf16.gmra.mxu1 %v841_v54 }
 0x101   :  { %v569_v60 = vadd.f32 %v1984_v50, %v568_v59  ;;  %v787_v61 = vmax.f32 %v577_v57, 0.0 }
 0x102   :  { %v1517_v62 = vpop.f32.mrf.mxu0 }
 0x103   :  { %v785_v0 = vmax.f32 %v569_v60, 0.0  ;;  %v843_v5 = vpack.c.bf16 %v787_v61, %v786_v1  ;;  %v590_v11 = vadd.f32 %v1517_v62, %v1984_v50 }
 0x104   :  { %v581_v2 = vpop.f32.mrf.mxu0 }
 0x105   :  { %v842_v3 = vpack.c.bf16 %v785_v0, %v784_v63  ;;  %v582_v7 = vadd.f32 %v1984_v50, %v581_v2  ;;  %v790_v36 = vmax.f32 %v590_v11, 0.0 }
 0x106   :  { %v1518_v6 = vpop.f32.mrf.mxu0 }
 0x107   :  { %v593_v8 = vadd.f32 %v1518_v6, %v1984_v50  ;;  %1591 = vmatprep.mubr.bf16.mxu1 %v842_v3  ;;  %v788_v32 = vmax.f32 %v582_v7, 0.0 }
 0x108   :  { %v584_v12 = vpop.f32.mrf.mxu0  ;;  %1592 = vmatmul.mubr.bf16.gmra.mxu1 %v843_v5 }
 0x109   :  { %v585_v13 = vadd.f32 %v1984_v50, %v584_v12  ;;  %v791_v15 = vmax.f32 %v593_v8, 0.0 }
 0x10a   :  { %v1521_v17 = vpop.f32.mrf.mxu0 }
 0x10b   :  { %v789_v35 = vmax.f32 %v585_v13, 0.0  ;;  %v845_v43 = vpack.c.bf16 %v791_v15, %v790_v36  ;;  %v606_v47 = vadd.f32 %v1521_v17, %v1984_v50 }
 0x10c   :  { %v597_v40 = vpop.f32.mrf.mxu0 }
 0x10d   :  { %v844_v42 = vpack.c.bf16 %v789_v35, %v788_v32  ;;  %v598_v45 = vadd.f32 %v1984_v50, %v597_v40  ;;  %v794_v55 = vmax.f32 %v606_v47, 0.0 }
 0x10e   :  { %v1522_v44 = vpop.f32.mrf.mxu0 }
 0x10f   :  { %v609_v46 = vadd.f32 %v1522_v44, %v1984_v50  ;;  %1595 = vmatprep.mubr.bf16.mxu1 %v844_v42  ;;  %v792_v53 = vmax.f32 %v598_v45, 0.0 }
 0x110   :  { %v600_v48 = vpop.f32.mrf.mxu0  ;;  %1596 = vmatmul.mubr.bf16.gmra.mxu1 %v845_v43 }
 0x111   :  { %v601_v49 = vadd.f32 %v1984_v50, %v600_v48  ;;  %v795_v51 = vmax.f32 %v609_v46, 0.0 }
 0x112   :  { %v1525_v52 = vpop.f32.mrf.mxu0 }
 0x113   :  { %v793_v54 = vmax.f32 %v601_v49, 0.0  ;;  %v847_v58 = vpack.c.bf16 %v795_v51, %v794_v55  ;;  %v622_v62 = vadd.f32 %v1525_v52, %v1984_v50 }
 0x114   :  { %v613_v56 = vpop.f32.mrf.mxu0 }
 0x115   :  { %v846_v57 = vpack.c.bf16 %v793_v54, %v792_v53  ;;  %v614_v60 = vadd.f32 %v1984_v50, %v613_v56  ;;  %v798_v6 = vmax.f32 %v622_v62, 0.0 }
 0x116   :  { %v1526_v59 = vpop.f32.mrf.mxu0 }
 0x117   :  { %v625_v61 = vadd.f32 %v1526_v59, %v1984_v50  ;;  %1599 = vmatprep.mubr.bf16.mxu1 %v846_v57  ;;  %v796_v3 = vmax.f32 %v614_v60, 0.0 }
 0x118   :  { %v616_v63 = vpop.f32.mrf.mxu0  ;;  %1600 = vmatmul.mubr.bf16.gmra.mxu1 %v847_v58 }
 0x119   :  { %v617_v0 = vadd.f32 %v1984_v50, %v616_v63  ;;  %v799_v1 = vmax.f32 %v625_v61, 0.0 }
 0x11a   :  { %v1529_v2 = vpop.f32.mrf.mxu0 }
 0x11b   :  { %v797_v5 = vmax.f32 %v617_v0, 0.0  ;;  %v849_v11 = vpack.c.bf16 %v799_v1, %v798_v6  ;;  %v638_v17 = vadd.f32 %v1529_v2, %v1984_v50 }
 0x11c   :  { %v629_v7 = vpop.f32.mrf.mxu0 }
 0x11d   :  { %v848_v8 = vpack.c.bf16 %v797_v5, %v796_v3  ;;  %v630_v13 = vadd.f32 %v1984_v50, %v629_v7  ;;  %v802_v44 = vmax.f32 %v638_v17, 0.0 }
 0x11e   :  { %v1530_v12 = vpop.f32.mrf.mxu0 }
 0x11f   :  { %v641_v15 = vadd.f32 %v1530_v12, %v1984_v50  ;;  %1603 = vmatprep.mubr.bf16.mxu1 %v848_v8  ;;  %v800_v42 = vmax.f32 %v630_v13, 0.0 }
 0x120   :  { %v632_v32 = vpop.f32.mrf.mxu0  ;;  %1604 = vmatmul.mubr.bf16.gmra.mxu1 %v849_v11 }
 0x121   :  { %v633_v35 = vadd.f32 %v1984_v50, %v632_v32  ;;  %v803_v36 = vmax.f32 %v641_v15, 0.0 }
 0x122   :  { %v1533_v40 = vpop.f32.mrf.mxu0 }
 0x123   :  { %v801_v43 = vmax.f32 %v633_v35, 0.0  ;;  %v851_v47 = vpack.c.bf16 %v803_v36, %v802_v44  ;;  %v654_v52 = vadd.f32 %v1533_v40, %v1984_v50 }
 0x124   :  { %v645_v45 = vpop.f32.mrf.mxu0 }
 0x125   :  { %v850_v46 = vpack.c.bf16 %v801_v43, %v800_v42  ;;  %v646_v49 = vadd.f32 %v1984_v50, %v645_v45  ;;  %v806_v59 = vmax.f32 %v654_v52, 0.0 }
 0x126   :  { %v1534_v48 = vpop.f32.mrf.mxu0 }
 0x127   :  { %v657_v51 = vadd.f32 %v1534_v48, %v1984_v50  ;;  %1607 = vmatprep.mubr.bf16.mxu1 %v850_v46  ;;  %v804_v57 = vmax.f32 %v646_v49, 0.0 }
 0x128   :  { %v648_v53 = vpop.f32.mrf.mxu0  ;;  %1608 = vmatmul.mubr.bf16.gmra.mxu1 %v851_v47 }
 0x129   :  { %v649_v54 = vadd.f32 %v1984_v50, %v648_v53  ;;  %v807_v55 = vmax.f32 %v657_v51, 0.0 }
 0x12a   :  { %v1537_v56 = vpop.f32.mrf.mxu0 }
 0x12b   :  { %v805_v58 = vmax.f32 %v649_v54, 0.0  ;;  %v853_v62 = vpack.c.bf16 %v807_v55, %v806_v59  ;;  %v670_v2 = vadd.f32 %v1537_v56, %v1984_v50 }
 0x12c   :  { %v661_v60 = vpop.f32.mrf.mxu0 }
 0x12d   :  { %v852_v61 = vpack.c.bf16 %v805_v58, %v804_v57  ;;  %v662_v0 = vadd.f32 %v1984_v50, %v661_v60  ;;  %v810_v12 = vmax.f32 %v670_v2, 0.0 }
 0x12e   :  { %v1538_v63 = vpop.f32.mrf.mxu0 }
 0x12f   :  { %v673_v1 = vadd.f32 %v1538_v63, %v1984_v50  ;;  %1611 = vmatprep.mubr.bf16.mxu1 %v852_v61  ;;  %v808_v8 = vmax.f32 %v662_v0, 0.0 }
 0x130   :  { %v664_v3 = vpop.f32.mrf.mxu0  ;;  %1612 = vmatmul.mubr.bf16.gmra.mxu1 %v853_v62 }
 0x131   :  { %v665_v5 = vadd.f32 %v1984_v50, %v664_v3  ;;  %v811_v6 = vmax.f32 %v673_v1, 0.0 }
 0x132   :  { %v1541_v7 = vpop.f32.mrf.mxu0 }
 0x133   :  { %v809_v11 = vmax.f32 %v665_v5, 0.0  ;;  %v855_v17 = vpack.c.bf16 %v811_v6, %v810_v12  ;;  %v686_v40 = vadd.f32 %v1541_v7, %v1984_v50 }
 0x134   :  { %v677_v13 = vpop.f32.mrf.mxu0 }
 0x135   :  { %v854_v15 = vpack.c.bf16 %v809_v11, %v808_v8  ;;  %v678_v35 = vadd.f32 %v1984_v50, %v677_v13  ;;  %v814_v48 = vmax.f32 %v686_v40, 0.0 }
 0x136   :  { %v1542_v32 = vpop.f32.mrf.mxu0 }
 0x137   :  { %v689_v36 = vadd.f32 %v1542_v32, %v1984_v50  ;;  %1615 = vmatprep.mubr.bf16.mxu1 %v854_v15  ;;  %v812_v46 = vmax.f32 %v678_v35, 0.0 }
 0x138   :  { %v680_v42 = vpop.f32.mrf.mxu0  ;;  %1616 = vmatmul.mubr.bf16.gmra.mxu1 %v855_v17 }
 0x139   :  { %v681_v43 = vadd.f32 %v1984_v50, %v680_v42  ;;  %v815_v44 = vmax.f32 %v689_v36, 0.0 }
 0x13a   :  { %v1545_v45 = vpop.f32.mrf.mxu0 }
 0x13b   :  { %v813_v47 = vmax.f32 %v681_v43, 0.0  ;;  %v857_v52 = vpack.c.bf16 %v815_v44, %v814_v48  ;;  %v702_v56 = vadd.f32 %v1545_v45, %v1984_v50 }
 0x13c   :  { %v693_v49 = vpop.f32.mrf.mxu0 }
 0x13d   :  { %v856_v51 = vpack.c.bf16 %v813_v47, %v812_v46  ;;  %v694_v54 = vadd.f32 %v1984_v50, %v693_v49  ;;  %v818_v63 = vmax.f32 %v702_v56, 0.0 }
 0x13e   :  { %v1546_v53 = vpop.f32.mrf.mxu0 }
 0x13f   :  { %v705_v55 = vadd.f32 %v1546_v53, %v1984_v50  ;;  %1619 = vmatprep.mubr.bf16.mxu1 %v856_v51  ;;  %v816_v61 = vmax.f32 %v694_v54, 0.0 }
 0x140   :  { %v696_v57 = vpop.f32.mrf.mxu0  ;;  %1620 = vmatmul.mubr.bf16.gmra.mxu1 %v857_v52 }
 0x141   :  { %v697_v58 = vadd.f32 %v1984_v50, %v696_v57  ;;  %v819_v59 = vmax.f32 %v705_v55, 0.0 }
 0x142   :  { %v1549_v60 = vpop.f32.mrf.mxu0 }
 0x143   :  { %v817_v62 = vmax.f32 %v697_v58, 0.0  ;;  %v859_v2 = vpack.c.bf16 %v819_v59, %v818_v63  ;;  %v718_v7 = vadd.f32 %v1549_v60, %v1984_v50 }
 0x144   :  { %v709_v0 = vpop.f32.mrf.mxu0 }
 0x145   :  { %v858_v1 = vpack.c.bf16 %v817_v62, %v816_v61  ;;  %v710_v5 = vadd.f32 %v1984_v50, %v709_v0  ;;  %v822_v32 = vmax.f32 %v718_v7, 0.0 }
 0x146   :  { %v1550_v3 = vpop.f32.mrf.mxu0 }
 0x147   :  { %v721_v6 = vadd.f32 %v1550_v3, %v1984_v50  ;;  %1623 = vmatprep.mubr.bf16.mxu1 %v858_v1  ;;  %v820_v15 = vmax.f32 %v710_v5, 0.0 }
 0x148   :  { %v712_v8 = vpop.f32.mrf.mxu0  ;;  %1624 = vmatmul.mubr.bf16.gmra.mxu1 %v859_v2 }
 0x149   :  { %v713_v11 = vadd.f32 %v1984_v50, %v712_v8  ;;  %v823_v12 = vmax.f32 %v721_v6, 0.0 }
 0x14a   :  { %v1553_v13 = vpop.f32.mrf.mxu0 }
 0x14b   :  { %v821_v17 = vmax.f32 %v713_v11, 0.0  ;;  %v861_v40 = vpack.c.bf16 %v823_v12, %v822_v32  ;;  %v734_v45 = vadd.f32 %v1553_v13, %v1984_v50 }
 0x14c   :  { %v725_v35 = vpop.f32.mrf.mxu0 }
 0x14d   :  { %v860_v36 = vpack.c.bf16 %v821_v17, %v820_v15  ;;  %v726_v43 = vadd.f32 %v1984_v50, %v725_v35  ;;  %v826_v53 = vmax.f32 %v734_v45, 0.0  ;;  %v2054_v45 = vld [vmem:[%s2390_s4] ss:$0 sm:$0xff] }
 0x14e   :  { %v1554_v42 = vpop.f32.mrf.mxu0 }
 0x14f   :  { %v737_v44 = vadd.f32 %v1554_v42, %v1984_v50  ;;  %1627 = vmatprep.mubr.bf16.mxu1 %v860_v36  ;;  %v824_v51 = vmax.f32 %v726_v43, 0.0 }
 0x150   :  { %v728_v46 = vpop.f32.mrf.mxu0  ;;  %1628 = vmatmul.mubr.bf16.gmra.mxu1 %v861_v40 }
 0x151   :  { %v729_v47 = vadd.f32 %v1984_v50, %v728_v46  ;;  %v827_v48 = vmax.f32 %v737_v44, 0.0  ;;  %v87_v44 = vunpack.c.l.bf16 %v1795_v9  ;;  %v85_v46 = vunpack.c.l.bf16 %v1777_v4 }
 0x152   :  { %v1557_v49 = vpop.f32.mrf.mxu0 }
 0x153   :  { %v825_v52 = vmax.f32 %v729_v47, 0.0  ;;  %v863_v56 = vpack.c.bf16 %v827_v48, %v826_v53  ;;  %v750_v60 = vadd.f32 %v1557_v49, %v1984_v50  ;;  %v158_v47 = vadd.f32 %v2054_v45, %v87_v44 }
 0x154   :  { %v741_v54 = vpop.f32.mrf.mxu0  ;;  %v86_v48 = vunpack.c.h.bf16 %v1777_v4  ;;  %v156_v49 = vadd.f32 %v2054_v45, %v85_v46 }
 0x155   :  { %v862_v55 = vpack.c.bf16 %v825_v52, %v824_v51  ;;  %v742_v58 = vadd.f32 %v1984_v50, %v741_v54  ;;  %v830_v3 = vmax.f32 %v750_v60, 0.0  ;;  %v91_v54 = vunpack.c.l.bf16 %v1816_v14 }
 0x156   :  { %v1558_v57 = vpop.f32.mrf.mxu0  ;;  %v92_v60 = vunpack.c.h.bf16 %v1816_v14  ;;  %v95_v14 = vunpack.c.l.bf16 %v1834_v18 }
 0x157   :  { %v753_v59 = vadd.f32 %v1558_v57, %v1984_v50  ;;  %1631 = vmatprep.mubr.bf16.mxu1 %v862_v55  ;;  %v828_v1 = vmax.f32 %v742_v58, 0.0  ;;  %v157_v57 = vadd.f32 %v2054_v45, %v86_v48 }
 0x158   :  { %v744_v61 = vpop.f32.mrf.mxu0  ;;  %1632 = vmatmul.mubr.bf16.gmra.mxu1 %v863_v56 }
 0x159   :  { %v745_v62 = vadd.f32 %v1984_v50, %v744_v61  ;;  %v831_v63 = vmax.f32 %v753_v59, 0.0  ;;  %v162_v59 = vadd.f32 %v2054_v45, %v91_v54  ;;  %v98_v54 = vunpack.c.h.bf16 %v1839_v19 }
 0x15a   :  { %v1561_v0 = vpop.f32.mrf.mxu0 }
 0x15b   :  { %v829_v2 = vmax.f32 %v745_v62, 0.0  ;;  %v865_v7 = vpack.c.bf16 %v831_v63, %v830_v3  ;;  %v766_v13 = vadd.f32 %v1561_v0, %v1984_v50  ;;  %v90_v0 = vunpack.c.h.bf16 %v1800_v10 }
 0x15c   :  { %v757_v5 = vpop.f32.mrf.mxu0  ;;  %v163_v3 = vadd.f32 %v2054_v45, %v92_v60 }
 0x15d   :  { %v864_v6 = vpack.c.bf16 %v829_v2, %v828_v1  ;;  %v758_v11 = vadd.f32 %v1984_v50, %v757_v5  ;;  %v834_v40 = vmax.f32 %v766_v13, 0.0  ;;  %v96_v13 = vunpack.c.h.bf16 %v1834_v18 }
 0x15e   :  { %v1562_v8 = vpop.f32.mrf.mxu0  ;;  %v99_v18 = vunpack.c.l.bf16 %v1846_v20 }
 0x15f   :  { %v769_v12 = vadd.f32 %v1562_v8, %v1984_v50  ;;  %1635 = vmatprep.mubr.bf16.mxu1 %v864_v6  ;;  %v832_v35 = vmax.f32 %v758_v11, 0.0 }
 0x160   :  { %v760_v15 = vpop.f32.mrf.mxu0  ;;  %1636 = vmatmul.mubr.bf16.gmra.mxu1 %v865_v7  ;;  %v161_v7 = vadd.f32 %v2054_v45, %v90_v0  ;;  %v170_v48 = vadd.f32 %v2054_v45, %v99_v18 }
 0x161   :  { %v761_v17 = vadd.f32 %v1984_v50, %v760_v15  ;;  %v835_v32 = vmax.f32 %v769_v12, 0.0  ;;  %v88_v50 = vunpack.c.h.bf16 %v1795_v9  ;;  %v89_v9 = vunpack.c.l.bf16 %v1800_v10 }
 0x162   :  { %v93_v10 = vunpack.c.l.bf16 %v1824_v16  ;;  %v166_v12 = vadd.f32 %v2054_v45, %v95_v14 }
 0x163   :  { %v833_v36 = vmax.f32 %v761_v17, 0.0  ;;  %v867_v43 = vpack.c.bf16 %v835_v32, %v834_v40  ;;  %v159_v53 = vadd.f32 %v2054_v45, %v88_v50  ;;  %v160_v63 = vadd.f32 %v2054_v45, %v89_v9 }
 0x164   :  { %v164_v32 = vadd.f32 %v2054_v45, %v93_v10 }
 0x165   :  { %v866_v42 = vpack.c.bf16 %v833_v36, %v832_v35  ;;  %v94_v35 = vunpack.c.h.bf16 %v1824_v16  ;;  %v97_v16 = vunpack.c.l.bf16 %v1839_v19  ;;  %v101_v19 = vunpack.c.l.bf16 %v1851_v21 }
 0x167   :  { %1639 = vmatprep.mubr.bf16.mxu1 %v866_v42  ;;  %v167_v42 = vadd.f32 %v2054_v45, %v96_v13  ;;  %v165_v46 = vadd.f32 %v2054_v45, %v94_v35  ;;  %v108_v13 = vunpack.c.h.bf16 %v1870_v24  ;;  %v106_v35 = vunpack.c.h.bf16 %v1863_v23 }
 0x168   :  { %1640 = vmatmul.mubr.bf16.gmra.mxu1 %v867_v43 }
 0x1b0   :  { %v1581_v51 = vpop.f32.mrf.mxu1 }
 0x1b1   :  { %v1223_v52 = vadd.f32 %v1581_v51, %v158_v47 }
 0x1b2   :  { %v966_v55 = vpop.f32.mrf.mxu1 }
 0x1b3   :  { %1287 = vst [vmem:[%s2391_s5 + $0x10] sm:$0xff] %v1223_v52  ;;  %v1221_v56 = vadd.f32 %v966_v55, %v156_v49  ;;  %v100_v49 = vunpack.c.h.bf16 %v1846_v20  ;;  %v103_v20 = vunpack.c.l.bf16 %v1858_v22 }
 0x1b4   :  { %v1582_v58 = vpop.f32.mrf.mxu1 }
 0x1b5   :  { %1285 = vst [vmem:[%s2391_s5] sm:$0xff] %v1221_v56  ;;  %v1224_v4 = vadd.f32 %v1582_v58, %v159_v53  ;;  %v168_v53 = vadd.f32 %v2054_v45, %v97_v16 }
 0x1b6   :  { %v969_v61 = vpop.f32.mrf.mxu1 }
 0x1b7   :  { %1288 = vst [vmem:[%s2391_s5 + $0x18] sm:$0xff] %v1224_v4  ;;  %v1222_v62 = vadd.f32 %v969_v61, %v157_v57  ;;  %v171_v57 = vadd.f32 %v2054_v45, %v100_v49  ;;  %v169_v4 = vadd.f32 %v2054_v45, %v98_v54  ;;  %v174_v61 = vadd.f32 %v2054_v45, %v103_v20 }
 0x1b8   :  { %v1585_v1 = vpop.f32.mrf.mxu1 }
 0x1b9   :  { %1286 = vst [vmem:[%s2391_s5 + $0x8] sm:$0xff] %v1222_v62  ;;  %v1227_v2 = vadd.f32 %v1585_v1, %v162_v59  ;;  %v104_v62 = vunpack.c.h.bf16 %v1858_v22  ;;  %v172_v1 = vadd.f32 %v2054_v45, %v101_v19  ;;  %v107_v22 = vunpack.c.l.bf16 %v1870_v24 }
 0x1ba   :  { %v982_v5 = vpop.f32.mrf.mxu1  ;;  %v111_v24 = vunpack.c.l.bf16 %v1882_v26  ;;  %v116_v19 = vunpack.c.h.bf16 %v1894_v28 }
 0x1bb   :  { %1291 = vst [vmem:[%s2391_s5 + $0x30] sm:$0xff] %v1227_v2  ;;  %v1225_v6 = vadd.f32 %v982_v5, %v160_v63  ;;  %v102_v2 = vunpack.c.h.bf16 %v1851_v21  ;;  %v175_v5 = vadd.f32 %v2054_v45, %v104_v62  ;;  %v105_v21 = vunpack.c.l.bf16 %v1863_v23 }
 0x1bc   :  { %v1586_v8 = vpop.f32.mrf.mxu1  ;;  %v109_v23 = vunpack.c.l.bf16 %v1875_v25  ;;  %v114_v62 = vunpack.c.h.bf16 %v1887_v27 }
 0x1bd   :  { %1289 = vst [vmem:[%s2391_s5 + $0x20] sm:$0xff] %v1225_v6  ;;  %v1228_v11 = vadd.f32 %v1586_v8, %v163_v3  ;;  %v173_v10 = vadd.f32 %v2054_v45, %v102_v2 }
 0x1be   :  { %v985_v15 = vpop.f32.mrf.mxu1 }
 0x1bf   :  { %1292 = vst [vmem:[%s2391_s5 + $0x38] sm:$0xff] %v1228_v11  ;;  %v1226_v17 = vadd.f32 %v985_v15, %v161_v7 }
 0x1c0   :  { %v1589_v36 = vpop.f32.mrf.mxu1 }
 0x1c1   :  { %1290 = vst [vmem:[%s2391_s5 + $0x28] sm:$0xff] %v1226_v17  ;;  %v1231_v40 = vadd.f32 %v1589_v36, %v166_v12  ;;  %v178_v12 = vadd.f32 %v2054_v45, %v107_v22 }
 0x1c2   :  { %v998_v43 = vpop.f32.mrf.mxu1 }
 0x1c3   :  { %1295 = vst [vmem:[%s2391_s5 + $0x50] sm:$0xff] %v1231_v40  ;;  %v1229_v44 = vadd.f32 %v998_v43, %v164_v32  ;;  %v176_v32 = vadd.f32 %v2054_v45, %v105_v21 }
 0x1c4   :  { %v1590_v47 = vpop.f32.mrf.mxu1 }
 0x1c5   :  { %1293 = vst [vmem:[%s2391_s5 + $0x40] sm:$0xff] %v1229_v44  ;;  %v1232_v50 = vadd.f32 %v1590_v47, %v167_v42  ;;  %v179_v42 = vadd.f32 %v2054_v45, %v108_v13  ;;  %v177_v44 = vadd.f32 %v2054_v45, %v106_v35  ;;  %v182_v47 = vadd.f32 %v2054_v45, %v111_v24 }
 0x1c6   :  { %v1001_v51 = vpop.f32.mrf.mxu1  ;;  %v124_v24 = vunpack.c.h.bf16 %v1921_v33 }
 0x1c7   :  { %1296 = vst [vmem:[%s2391_s5 + $0x58] sm:$0xff] %v1232_v50  ;;  %v1230_v52 = vadd.f32 %v1001_v51, %v165_v46  ;;  %v112_v50 = vunpack.c.h.bf16 %v1882_v26  ;;  %v180_v51 = vadd.f32 %v2054_v45, %v109_v23  ;;  %v115_v26 = vunpack.c.l.bf16 %v1894_v28 }
 0x1c8   :  { %v1593_v55 = vpop.f32.mrf.mxu1  ;;  %v119_v28 = vunpack.c.l.bf16 %v1906_v30  ;;  %v122_v23 = vunpack.c.h.bf16 %v1911_v31 }
 0x1c9   :  { %1294 = vst [vmem:[%s2391_s5 + $0x48] sm:$0xff] %v1230_v52  ;;  %v1235_v56 = vadd.f32 %v1593_v55, %v170_v48  ;;  %v110_v52 = vunpack.c.h.bf16 %v1875_v25  ;;  %v183_v55 = vadd.f32 %v2054_v45, %v112_v50  ;;  %v113_v25 = vunpack.c.l.bf16 %v1887_v27 }
 0x1ca   :  { %v1014_v9 = vpop.f32.mrf.mxu1  ;;  %v117_v27 = vunpack.c.l.bf16 %v1899_v29 }
 0x1cb   :  { %1299 = vst [vmem:[%s2391_s5 + $0x70] sm:$0xff] %v1235_v56  ;;  %v1233_v58 = vadd.f32 %v1014_v9, %v168_v53  ;;  %v181_v20 = vadd.f32 %v2054_v45, %v110_v52 }
 0x1cc   :  { %v1594_v59 = vpop.f32.mrf.mxu1 }
 0x1cd   :  { %1297 = vst [vmem:[%s2391_s5 + $0x60] sm:$0xff] %v1233_v58  ;;  %v1236_v60 = vadd.f32 %v1594_v59, %v171_v57 }
 0x1ce   :  { %v1017_v63 = vpop.f32.mrf.mxu1 }
 0x1cf   :  { %1300 = vst [vmem:[%s2391_s5 + $0x78] sm:$0xff] %v1236_v60  ;;  %v1234_v0 = vadd.f32 %v1017_v63, %v169_v4  ;;  %v186_v4 = vadd.f32 %v2054_v45, %v115_v26 }
 0x1d0   :  { %v1597_v3 = vpop.f32.mrf.mxu1 }
 0x1d1   :  { %1298 = vst [vmem:[%s2391_s5 + $0x68] sm:$0xff] %v1234_v0  ;;  %v1239_v14 = vadd.f32 %v1597_v3, %v174_v61  ;;  %v184_v61 = vadd.f32 %v2054_v45, %v113_v25 }
 0x1d2   :  { %v1030_v6 = vpop.f32.mrf.mxu1 }
 0x1d3   :  { %1303 = vst [vmem:[%s2391_s5 + $0x90] sm:$0xff] %v1239_v14  ;;  %v1237_v7 = vadd.f32 %v1030_v6, %v172_v1  ;;  %v187_v1 = vadd.f32 %v2054_v45, %v116_v19  ;;  %v185_v14 = vadd.f32 %v2054_v45, %v114_v62  ;;  %v190_v6 = vadd.f32 %v2054_v45, %v119_v28 }
 0x1d4   :  { %v1598_v8 = vpop.f32.mrf.mxu1  ;;  %v132_v62 = vunpack.c.h.bf16 %v1951_v39 }
 0x1d5   :  { %1301 = vst [vmem:[%s2391_s5 + $0x80] sm:$0xff] %v1237_v7  ;;  %v1240_v11 = vadd.f32 %v1598_v8, %v175_v5  ;;  %v120_v7 = vunpack.c.h.bf16 %v1906_v30  ;;  %v188_v8 = vadd.f32 %v2054_v45, %v117_v27  ;;  %v123_v30 = vunpack.c.l.bf16 %v1921_v33 }
 0x1d6   :  { %v1033_v15 = vpop.f32.mrf.mxu1  ;;  %v127_v33 = vunpack.c.l.bf16 %v1939_v37 }
 0x1d7   :  { %1304 = vst [vmem:[%s2391_s5 + $0x98] sm:$0xff] %v1240_v11  ;;  %v1238_v17 = vadd.f32 %v1033_v15, %v173_v10  ;;  %v118_v11 = vunpack.c.h.bf16 %v1899_v29  ;;  %v191_v15 = vadd.f32 %v2054_v45, %v120_v7  ;;  %v121_v29 = vunpack.c.l.bf16 %v1911_v31 }
 0x1d8   :  { %v1601_v36 = vpop.f32.mrf.mxu1  ;;  %v125_v31 = vunpack.c.l.bf16 %v1926_v34 }
 0x1d9   :  { %1302 = vst [vmem:[%s2391_s5 + $0x88] sm:$0xff] %v1238_v17  ;;  %v1243_v40 = vadd.f32 %v1601_v36, %v178_v12  ;;  %v189_v35 = vadd.f32 %v2054_v45, %v118_v11 }
 0x1da   :  { %v1046_v18 = vpop.f32.mrf.mxu1 }
 0x1db   :  { %1307 = vst [vmem:[%s2391_s5 + $0xb0] sm:$0xff] %v1243_v40  ;;  %v1241_v43 = vadd.f32 %v1046_v18, %v176_v32 }
 0x1dc   :  { %v1602_v46 = vpop.f32.mrf.mxu1 }
 0x1dd   :  { %1305 = vst [vmem:[%s2391_s5 + $0xa0] sm:$0xff] %v1241_v43  ;;  %v1244_v16 = vadd.f32 %v1602_v46, %v179_v42  ;;  %v194_v42 = vadd.f32 %v2054_v45, %v123_v30 }
 0x1de   :  { %v1049_v48 = vpop.f32.mrf.mxu1 }
 0x1df   :  { %1308 = vst [vmem:[%s2391_s5 + $0xb8] sm:$0xff] %v1244_v16  ;;  %v1242_v49 = vadd.f32 %v1049_v48, %v177_v44  ;;  %v192_v44 = vadd.f32 %v2054_v45, %v121_v29  ;;  %v1726_v29 = vld [vmem:[%s2387_s0 + $0xd8] sm:$0xff]  }
 0x1e0   :  { %v1605_v53 = vpop.f32.mrf.mxu1 }
 0x1e1   :  { %1306 = vst [vmem:[%s2391_s5 + $0xa8] sm:$0xff] %v1242_v49  ;;  %v1247_v54 = vadd.f32 %v1605_v53, %v182_v47  ;;  %v195_v47 = vadd.f32 %v2054_v45, %v124_v24  ;;  %v193_v49 = vadd.f32 %v2054_v45, %v122_v23  ;;  %v198_v53 = vadd.f32 %v2054_v45, %v127_v33 }
 0x1e2   :  { %v1062_v56 = vpop.f32.mrf.mxu1 }
 0x1e3   :  { %1311 = vst [vmem:[%s2391_s5 + $0xd0] sm:$0xff] %v1247_v54  ;;  %v1245_v57 = vadd.f32 %v1062_v56, %v180_v51  ;;  %v128_v54 = vunpack.c.h.bf16 %v1939_v37  ;;  %v196_v56 = vadd.f32 %v2054_v45, %v125_v31  ;;  %v131_v37 = vunpack.c.l.bf16 %v1951_v39 }
 0x1e4   :  { %v1606_v9 = vpop.f32.mrf.mxu1  ;;  %v203_v39 = vadd.f32 %v2054_v45, %v132_v62  ;;  %v1730_v62 = vld [vmem:[%s2387_s0 + $0xf8] sm:$0xff]  }
 0x1e5   :  { %1309 = vst [vmem:[%s2391_s5 + $0xc0] sm:$0xff] %v1245_v57  ;;  %v1248_v58 = vadd.f32 %v1606_v9, %v183_v55  ;;  %v126_v57 = vunpack.c.h.bf16 %v1926_v34  ;;  %v199_v9 = vadd.f32 %v2054_v45, %v128_v54  ;;  %v129_v34 = vunpack.c.l.bf16 %v1944_v38  ;;  %v1723_v38 = vld [vmem:[%s2387_s0 + $0xb0] sm:$0xff]  }
 0x1e6   :  { %v1065_v59 = vpop.f32.mrf.mxu1  ;;  %v130_v28 = vunpack.c.h.bf16 %v1723_v38 }
 0x1e7   :  { %1312 = vst [vmem:[%s2391_s5 + $0xd8] sm:$0xff] %v1248_v58  ;;  %v1246_v60 = vadd.f32 %v1065_v59, %v181_v20  ;;  %v197_v19 = vadd.f32 %v2054_v45, %v126_v57 }
 0x1e8   :  { %v1609_v63 = vpop.f32.mrf.mxu1 }
 0x1e9   :  { %1310 = vst [vmem:[%s2391_s5 + $0xc8] sm:$0xff] %v1246_v60  ;;  %v1251_v0 = vadd.f32 %v1609_v63, %v186_v4 }
 0x1ea   :  { %v1078_v2 = vpop.f32.mrf.mxu1 }
 0x1eb   :  { %1315 = vst [vmem:[%s2391_s5 + $0xf0] sm:$0xff] %v1251_v0  ;;  %v1249_v3 = vadd.f32 %v1078_v2, %v184_v61  ;;  %v202_v61 = vadd.f32 %v2054_v45, %v131_v37 }
 0x1ec   :  { %v1610_v5 = vpop.f32.mrf.mxu1 }
 0x1ed   :  { %1313 = vst [vmem:[%s2391_s5 + $0xe0] sm:$0xff] %v1249_v3  ;;  %v1252_v22 = vadd.f32 %v1610_v5, %v187_v1  ;;  %v200_v1 = vadd.f32 %v2054_v45, %v129_v34 }
 0x1ee   :  { %v1081_v10 = vpop.f32.mrf.mxu1 }
 0x1ef   :  { %1316 = vst [vmem:[%s2391_s5 + $0xf8] sm:$0xff] %v1252_v22  ;;  %v1250_v21 = vadd.f32 %v1081_v10, %v185_v14  ;;  %v135_v14 = vunpack.c.l.bf16 %v1960_v41  ;;  %v201_v22 = vadd.f32 %v2054_v45, %v130_v28  ;;  %v1731_v28 = vld [vmem:[%s2387_s0 + $0xf0] sm:$0xff]  }
 0x1f0   :  { %v1613_v12 = vpop.f32.mrf.mxu1 }
 0x1f1   :  { %1314 = vst [vmem:[%s2391_s5 + $0xe8] sm:$0xff] %v1250_v21  ;;  %v1255_v13 = vadd.f32 %v1613_v12, %v190_v6  ;;  %v1724_v6 = vld [vmem:[%s2387_s0 + $0xc0] sm:$0xff]   ;;  %v206_v41 = vadd.f32 %v2054_v45, %v135_v14 }
 0x1f2   :  { %v1094_v17 = vpop.f32.mrf.mxu1  ;;  %v133_v7 = vunpack.c.l.bf16 %v1724_v6  ;;  %v134_v30 = vunpack.c.h.bf16 %v1724_v6 }
 0x1f3   :  { %1319 = vst [vmem:[%s2391_s5 + $0x110] sm:$0xff] %v1255_v13  ;;  %v1253_v32 = vadd.f32 %v1094_v17, %v188_v8  ;;  %v1725_v8 = vld [vmem:[%s2387_s0 + $0xc8] sm:$0xff]  }
 0x1f4   :  { %v1614_v36 = vpop.f32.mrf.mxu1  ;;  %v136_v11 = vunpack.c.h.bf16 %v1725_v8  ;;  %v205_v24 = vadd.f32 %v2054_v45, %v134_v30 }
 0x1f5   :  { %1317 = vst [vmem:[%s2391_s5 + $0x100] sm:$0xff] %v1253_v32  ;;  %v1256_v40 = vadd.f32 %v1614_v36, %v191_v15  ;;  %v204_v15 = vadd.f32 %v2054_v45, %v133_v7  ;;  %v139_v36 = vunpack.c.l.bf16 %v1726_v29  ;;  %v146_v7 = vunpack.c.h.bf16 %v1731_v28 }
 0x1f6   :  { %v1097_v18 = vpop.f32.mrf.mxu1 }
 0x1f7   :  { %1320 = vst [vmem:[%s2391_s5 + $0x118] sm:$0xff] %v1256_v40  ;;  %v1254_v43 = vadd.f32 %v1097_v18, %v189_v35  ;;  %v207_v35 = vadd.f32 %v2054_v45, %v136_v11  ;;  %v1727_v18 = vld [vmem:[%s2387_s0 + $0xd0] sm:$0xff]  }
 0x1f8   :  { %v1617_v46 = vpop.f32.mrf.mxu1 }
 0x1f9   :  { %1318 = vst [vmem:[%s2391_s5 + $0x108] sm:$0xff] %v1254_v43  ;;  %v1259_v16 = vadd.f32 %v1617_v46, %v194_v42  ;;  %v137_v43 = vunpack.c.l.bf16 %v1727_v18  ;;  %v210_v46 = vadd.f32 %v2054_v45, %v139_v36 }
 0x1fa   :  { %v1110_v50 = vpop.f32.mrf.mxu1 }
 0x1fb   :  { %1323 = vst [vmem:[%s2391_s5 + $0x130] sm:$0xff] %v1259_v16  ;;  %v1257_v48 = vadd.f32 %v1110_v50, %v192_v44  ;;  %v140_v16 = vunpack.c.h.bf16 %v1726_v29  ;;  %v208_v50 = vadd.f32 %v2054_v45, %v137_v43 }
 0x1fc   :  { %v1618_v51 = vpop.f32.mrf.mxu1 }
 0x1fd   :  { %1321 = vst [vmem:[%s2391_s5 + $0x120] sm:$0xff] %v1257_v48  ;;  %v1260_v52 = vadd.f32 %v1618_v51, %v195_v47  ;;  %v138_v48 = vunpack.c.h.bf16 %v1727_v18  ;;  %v211_v51 = vadd.f32 %v2054_v45, %v140_v16 }
 0x1fe   :  { %v1113_v55 = vpop.f32.mrf.mxu1 }
 0x1ff   :  { %1324 = vst [vmem:[%s2391_s5 + $0x138] sm:$0xff] %v1260_v52  ;;  %v1258_v26 = vadd.f32 %v1113_v55, %v193_v49  ;;  %v1728_v52 = vld [vmem:[%s2387_s0 + $0xe8] sm:$0xff]  }
 0x200   :  { %v1621_v20 = vpop.f32.mrf.mxu1  ;;  %v144_v37 = vunpack.c.h.bf16 %v1728_v52 }
 0x201   :  { %1322 = vst [vmem:[%s2391_s5 + $0x128] sm:$0xff] %v1258_v26  ;;  %v1263_v25 = vadd.f32 %v1621_v20, %v198_v53  ;;  %v143_v53 = vunpack.c.l.bf16 %v1728_v52  ;;  %v209_v26 = vadd.f32 %v2054_v45, %v138_v48 }
 0x202   :  { %v1126_v58 = vpop.f32.mrf.mxu1 }
 0x203   :  { %1327 = vst [vmem:[%s2391_s5 + $0x150] sm:$0xff] %v1263_v25  ;;  %v1261_v4 = vadd.f32 %v1126_v58, %v196_v56  ;;  %v1729_v56 = vld [vmem:[%s2387_s0 + $0xe0] sm:$0xff]  }
 0x204   :  { %v1622_v59 = vpop.f32.mrf.mxu1  ;;  %v141_v57 = vunpack.c.l.bf16 %v1729_v56  ;;  %v142_v34 = vunpack.c.h.bf16 %v1729_v56 }
 0x205   :  { %1325 = vst [vmem:[%s2391_s5 + $0x140] sm:$0xff] %v1261_v4  ;;  %v1264_v60 = vadd.f32 %v1622_v59, %v199_v9  ;;  %v214_v9 = vadd.f32 %v2054_v45, %v143_v53 }
 0x206   :  { %v1129_v63 = vpop.f32.mrf.mxu1  ;;  %v213_v38 = vadd.f32 %v2054_v45, %v142_v34 }
 0x207   :  { %1328 = vst [vmem:[%s2391_s5 + $0x158] sm:$0xff] %v1264_v60  ;;  %v1262_v0 = vadd.f32 %v1129_v63, %v197_v19  ;;  %v212_v19 = vadd.f32 %v2054_v45, %v141_v57  ;;  %v147_v63 = vunpack.c.l.bf16 %v1730_v62 }
 0x208   :  { %v1625_v2 = vpop.f32.mrf.mxu1 }
 0x209   :  { %1326 = vst [vmem:[%s2391_s5 + $0x148] sm:$0xff] %v1262_v0  ;;  %v1267_v3 = vadd.f32 %v1625_v2, %v202_v61  ;;  %v215_v61 = vadd.f32 %v2054_v45, %v144_v37  ;;  %v145_v2 = vunpack.c.l.bf16 %v1731_v28  ;;  %v218_v14 = vadd.f32 %v2054_v45, %v147_v63 }
 0x20a   :  { %v1142_v27 = vpop.f32.mrf.mxu1 }
 0x20b   :  { %1331 = vst [vmem:[%s2391_s5 + $0x170] sm:$0xff] %v1267_v3  ;;  %v1265_v5 = vadd.f32 %v1142_v27, %v200_v1  ;;  %v148_v27 = vunpack.c.h.bf16 %v1730_v62  ;;  %v216_v6 = vadd.f32 %v2054_v45, %v145_v2 }
 0x20c   :  { %v1626_v10 = vpop.f32.mrf.mxu1 }
 0x20d   :  { %1329 = vst [vmem:[%s2391_s5 + $0x160] sm:$0xff] %v1265_v5  ;;  %v1268_v21 = vadd.f32 %v1626_v10, %v203_v39 }
 0x20e   :  { %v1145_v12 = vpop.f32.mrf.mxu1 }
 0x20f   :  { %1332 = vst [vmem:[%s2391_s5 + $0x178] sm:$0xff] %v1268_v21  ;;  %v1266_v13 = vadd.f32 %v1145_v12, %v201_v22  ;;  %v217_v12 = vadd.f32 %v2054_v45, %v146_v7 }
 0x210   :  { %v1629_v17 = vpop.f32.mrf.mxu1 }
 0x211   :  { %1330 = vst [vmem:[%s2391_s5 + $0x168] sm:$0xff] %v1266_v13  ;;  %v1271_v32 = vadd.f32 %v1629_v17, %v206_v41  ;;  %v219_v41 = vadd.f32 %v2054_v45, %v148_v27 }
 0x212   :  { %v1158_v40 = vpop.f32.mrf.mxu1 }
 0x213   :  { %1335 = vst [vmem:[%s2391_s5 + $0x190] sm:$0xff] %v1271_v32  ;;  %v1269_v42 = vadd.f32 %v1158_v40, %v204_v15 }
 0x214   :  { %v1630_v44 = vpop.f32.mrf.mxu1 }
 0x215   :  { %1333 = vst [vmem:[%s2391_s5 + $0x180] sm:$0xff] %v1269_v42  ;;  %v1272_v23 = vadd.f32 %v1630_v44, %v207_v35 }
 0x216   :  { %v1161_v47 = vpop.f32.mrf.mxu1 }
 0x217   :  { %1336 = vst [vmem:[%s2391_s5 + $0x198] sm:$0xff] %v1272_v23  ;;  %v1270_v33 = vadd.f32 %v1161_v47, %v205_v24 }
 0x218   :  { %v1633_v49 = vpop.f32.mrf.mxu1 }
 0x219   :  { %1334 = vst [vmem:[%s2391_s5 + $0x188] sm:$0xff] %v1270_v33  ;;  %v1275_v31 = vadd.f32 %v1633_v49, %v210_v46 }
 0x21a   :  { %v1174_v54 = vpop.f32.mrf.mxu1 }
 0x21b   :  { %1339 = vst [vmem:[%s2391_s5 + $0x1b0] sm:$0xff] %v1275_v31  ;;  %v1273_v55 = vadd.f32 %v1174_v54, %v208_v50 }
 0x21c   :  { %v1634_v20 = vpop.f32.mrf.mxu1 }
 0x21d   :  { %1337 = vst [vmem:[%s2391_s5 + $0x1a0] sm:$0xff] %v1273_v55  ;;  %v1276_v25 = vadd.f32 %v1634_v20, %v211_v51 }
 0x21e   :  { %v1177_v58 = vpop.f32.mrf.mxu1 }
 0x21f   :  { %1340 = vst [vmem:[%s2391_s5 + $0x1b8] sm:$0xff] %v1276_v25  ;;  %v1274_v4 = vadd.f32 %v1177_v58, %v209_v26 }
 0x220   :  { %v1637_v59 = vpop.f32.mrf.mxu1 }
 0x221   :  { %1338 = vst [vmem:[%s2391_s5 + $0x1a8] sm:$0xff] %v1274_v4  ;;  %v1279_v60 = vadd.f32 %v1637_v59, %v214_v9 }
 0x222   :  { %v1190_v0 = vpop.f32.mrf.mxu1 }
 0x223   :  { %1343 = vst [vmem:[%s2391_s5 + $0x1d0] sm:$0xff] %v1279_v60  ;;  %v1277_v1 = vadd.f32 %v1190_v0, %v212_v19 }
 0x224   :  { %v1638_v3 = vpop.f32.mrf.mxu1 }
 0x225   :  { %1341 = vst [vmem:[%s2391_s5 + $0x1c0] sm:$0xff] %v1277_v1  ;;  %v1280_v39 = vadd.f32 %v1638_v3, %v215_v61 }
 0x226   :  { %v1193_v5 = vpop.f32.mrf.mxu1 }
 0x227   :  { %1344 = vst [vmem:[%s2391_s5 + $0x1d8] sm:$0xff] %v1280_v39  ;;  %v1278_v22 = vadd.f32 %v1193_v5, %v213_v38 }
 0x228   :  { %v1641_v10 = vpop.f32.mrf.mxu1 }
 0x229   :  { %1342 = vst [vmem:[%s2391_s5 + $0x1c8] sm:$0xff] %v1278_v22  ;;  %v1283_v21 = vadd.f32 %v1641_v10, %v218_v14 }
 0x22a   :  { %v1206_v8 = vpop.f32.mrf.mxu1 }
 0x22b   :  { %1347 = vst [vmem:[%s2391_s5 + $0x1f0] sm:$0xff] %v1283_v21  ;;  %v1281_v11 = vadd.f32 %v1206_v8, %v216_v6 }
 0x22c   :  { %v1642_v13 = vpop.f32.mrf.mxu1 }
 0x22d   :  { %1345 = vst [vmem:[%s2391_s5 + $0x1e0] sm:$0xff] %v1281_v11  ;;  %v1284_v15 = vadd.f32 %v1642_v13, %v219_v41 }
 0x22e   :  { %v1209_v30 = vpop.f32.mrf.mxu1 }
 0x22f   :  { %1348 = vst [vmem:[%s2391_s5 + $0x1f8] sm:$0xff] %v1284_v15  ;;  %v1282_v17 = vadd.f32 %v1209_v30, %v217_v12 }
 0x231   :  { %1346 = vst [vmem:[%s2391_s5 + $0x1e8] sm:$0xff] %v1282_v17 }

</bundles_post_ra>
